<compile_context>
chip_gen: v7x
topology: tpu7x:2x2x1
jax: 0.10.0
libtpu: 0.0.40
codegen_flags: <defaults>
</compile_context>

<pallas_src>
import math

import jax
import jax.numpy as jnp
from jax.experimental import pallas as pl
from jax.experimental.pallas import tpu as pltpu


# ---------------------------------------------------------------------------
# Kernel
# ---------------------------------------------------------------------------
def _adaptive_threshold_kernel(bias_ref, beta_ref, delta_ref, u_ref, p_ref, out_ref):
    # bias/beta/delta: (1, TK) f32, resident; u/p: (TB, TK) in the input dtype.
    u = u_ref[...].astype(jnp.float32)
    p = p_ref[...].astype(jnp.float32)
    t = bias_ref[...] + beta_ref[...] * u + delta_ref[...] * p
    out_ref[...] = jnp.clip(t, 0.0, 1.0).astype(out_ref.dtype)


# ---------------------------------------------------------------------------
# Tiling helpers
# ---------------------------------------------------------------------------
_TARGET_TILE_BYTES = 4 * 1024 * 1024   # per-stream tile budget (x3 streams x2 buffers ~= 24 MiB)
_MAX_TB = 1024
_MAX_SINGLE_TK = 8192                  # up to here we keep the whole class dim in one tile


def _round_down(x, m):
    return (x // m) * m


def _lane_dense_fold(B, K):
    """Smallest r with (r*K) % 128 == 0 and B % r == 0; 1 if no such fold applies."""
    if K % 128 == 0:
        return 1
    r0 = 128 // math.gcd(K, 128)
    if B % r0 == 0:
        return r0
    return 1


def _pick_tb(Bf, Kf, itemsize, sublane_mult):
    if Bf <= sublane_mult:
        return Bf
    tb = _TARGET_TILE_BYTES // max(1, Kf * itemsize)
    tb = min(tb, _MAX_TB, Bf)
    tb = max(_round_down(tb, sublane_mult), sublane_mult)
    # Keep >= 2 grid steps when possible so the "parallel" axis can shard across TCs (v7x).
    if pl.cdiv(Bf, tb) < 2 and Bf >= 2 * sublane_mult:
        tb = max(_round_down(Bf // 2, sublane_mult), sublane_mult)
    if tb >= Bf:
        tb = Bf
    return tb


# ---------------------------------------------------------------------------
# Pallas wrapper
# ---------------------------------------------------------------------------
def _adaptive_threshold_pallas(uncertainty, probabilities, alpha, beta, delta, base_threshold):
    B, K = uncertainty.shape
    out_dtype = uncertainty.dtype
    itemsize = jnp.dtype(out_dtype).itemsize
    sublane_mult = 16 if out_dtype == jnp.bfloat16 else 8

    # Fold alpha * t_base into a per-class bias (tiny O(K) op, not a big-stream pre-scale).
    bias = alpha.astype(jnp.float32) * jnp.float32(base_threshold)
    beta_f = beta.astype(jnp.float32)
    delta_f = delta.astype(jnp.float32)

    # Lane-dense fold of the contiguous [B, K] streams (free, metadata-only reshape).
    r = _lane_dense_fold(B, K)
    Bf, Kf = B // r, K * r
    u = uncertainty.reshape(Bf, Kf)
    p = probabilities.reshape(Bf, Kf)
    bias2 = jnp.tile(bias, r).reshape(1, Kf)
    beta2 = jnp.tile(beta_f, r).reshape(1, Kf)
    delta2 = jnp.tile(delta_f, r).reshape(1, Kf)

    cost = pl.CostEstimate(
        flops=6 * B * K,
        transcendentals=0,
        bytes_accessed=3 * B * K * itemsize + 3 * K * 4,
    )

    if Kf <= _MAX_SINGLE_TK:
        # Full-K tile, 1-D grid over (folded) batch; params DMA'd once and stay resident.
        TB = _pick_tb(Bf, Kf, itemsize, sublane_mult)
        grid = (pl.cdiv(Bf, TB),)
        data_spec = pl.BlockSpec((TB, Kf), lambda i: (i, 0))
        param_spec = pl.BlockSpec((1, Kf), lambda i: (0, 0))
        dims = ("parallel",)
    else:
        # Very wide (folded) class dim: 2-D grid with B innermost so the (1, TK) param tiles
        # stay resident across the inner loop; TK lane-dense.
        TK = 1024
        TB = _pick_tb(Bf, TK, itemsize, sublane_mult)
        grid = (pl.cdiv(Kf, TK), pl.cdiv(Bf, TB))
        data_spec = pl.BlockSpec((TB, TK), lambda j, i: (i, j))
        param_spec = pl.BlockSpec((1, TK), lambda j, i: (0, j))
        dims = ("parallel", "parallel")

    out = pl.pallas_call(
        _adaptive_threshold_kernel,
        out_shape=jax.ShapeDtypeStruct((Bf, Kf), out_dtype),
        grid=grid,
        in_specs=[param_spec, param_spec, param_spec, data_spec, data_spec],
        out_specs=data_spec,
        compiler_params=pltpu.CompilerParams(
            dimension_semantics=dims,
            vmem_limit_bytes=32 * 1024 * 1024,   # safe on v5e/v6e/v7x
        ),
        cost_estimate=cost,
    )(bias2, beta2, delta2, u, p)
    return out.reshape(B, K)


def _adaptive_threshold_ref(uncertainty, probabilities, alpha, beta, delta, base_threshold):
    u = uncertainty.astype(jnp.float32)
    p = probabilities.astype(jnp.float32)
    t = (alpha.astype(jnp.float32)[None, :] * jnp.float32(base_threshold)
         + beta.astype(jnp.float32)[None, :] * u
         + delta.astype(jnp.float32)[None, :] * p)
    return jnp.clip(t, 0.0, 1.0).astype(uncertainty.dtype)


def adaptive_threshold(uncertainty, probabilities, alpha, beta, delta,
                       base_threshold=0.5, *, force_pallas=False):
    """AdaptiveThreshold.forward. uncertainty/probabilities: [B, K]; alpha/beta/delta: [K]."""
    # Tiny workloads: a standalone Pallas call can't beat XLA fusion -> fall back to jnp.
    if not force_pallas and uncertainty.size < (128 * 1024):
        return _adaptive_threshold_ref(uncertainty, probabilities, alpha, beta, delta,
                                       base_threshold)
    return _adaptive_threshold_pallas(uncertainty, probabilities, alpha, beta, delta,
                                      base_threshold)


if __name__ == "__main__":
    base_threshold = 0.5

    # ---- Test 1: module-scale shapes (B=2 samples, K=16 classes), single full block ----
    B, K = 2, 16
    k_u, k_p, k_b, k_d = jax.random.split(jax.random.PRNGKey(0), 4)
    uncertainty = jax.random.uniform(k_u, (B, K), dtype=jnp.float32)
    probabilities = jax.random.uniform(k_p, (B, K), dtype=jnp.float32)
    alpha = jnp.ones((K,), dtype=jnp.float32)          # nn.Module default
    beta = 0.3 * jax.random.normal(k_b, (K,), dtype=jnp.float32)
    delta = 0.3 * jax.random.normal(k_d, (K,), dtype=jnp.float32)

    out = adaptive_threshold(uncertainty, probabilities, alpha, beta, delta,
                             base_threshold, force_pallas=True)
    out = jax.block_until_ready(out)
    ref = _adaptive_threshold_ref(uncertainty, probabilities, alpha, beta, delta, base_threshold)
    assert out.shape == (B, K)
    assert jnp.allclose(out, ref, atol=1e-6), "mismatch vs reference (small)"

    # ---- Test 2: lane-dense fold path (K=200 -> r=16, folded to [64, 3200], 2-step grid) ----
    B2, K2 = 1024, 200
    k_u2, k_p2, k_b2, k_d2 = jax.random.split(jax.random.PRNGKey(1), 4)
    u2 = jax.random.uniform(k_u2, (B2, K2), dtype=jnp.float32)
    p2 = jax.random.uniform(k_p2, (B2, K2), dtype=jnp.float32)
    a2 = jnp.ones((K2,), dtype=jnp.float32)
    b2 = 0.3 * jax.random.normal(k_b2, (K2,), dtype=jnp.float32)
    d2 = 0.3 * jax.random.normal(k_d2, (K2,), dtype=jnp.float32)

    out2 = adaptive_threshold(u2, p2, a2, b2, d2, base_threshold, force_pallas=True)
    out2 = jax.block_until_ready(out2)
    ref2 = _adaptive_threshold_ref(u2, p2, a2, b2, d2, base_threshold)
    assert out2.shape == (B2, K2)
    assert jnp.allclose(out2, ref2, atol=1e-6), "mismatch vs reference (folded)"

    # ---- Test 3: fold not possible (B % 16 != 0) -> full-K tiles, partial last batch tile ----
    B3, K3 = 1030, 200
    k_u3, k_p3, k_b3, k_d3 = jax.random.split(jax.random.PRNGKey(2), 4)
    u3 = jax.random.uniform(k_u3, (B3, K3), dtype=jnp.float32)
    p3 = jax.random.uniform(k_p3, (B3, K3), dtype=jnp.float32)
    a3 = jnp.ones((K3,), dtype=jnp.float32)
    b3 = 0.3 * jax.random.normal(k_b3, (K3,), dtype=jnp.float32)
    d3 = 0.3 * jax.random.normal(k_d3, (K3,), dtype=jnp.float32)

    out3 = adaptive_threshold(u3, p3, a3, b3, d3, base_threshold, force_pallas=True)
    out3 = jax.block_until_ready(out3)
    ref3 = _adaptive_threshold_ref(u3, p3, a3, b3, d3, base_threshold)
    assert out3.shape == (B3, K3)
    assert jnp.allclose(out3, ref3, atol=1e-6), "mismatch vs reference (unfolded fallback)"

    print("KERNEL_OK")
</pallas_src>

<mosaic_0001>
module attributes {stable_mosaic.version = 11 : i64} {
  func.func @_adaptive_threshold_kernel(%arg0: i32, %arg1: memref<1x16xf32, #tpu.memory_space<vmem>>, %arg2: memref<1x16xf32, #tpu.memory_space<vmem>>, %arg3: memref<1x16xf32, #tpu.memory_space<vmem>>, %arg4: memref<2x16xf32, #tpu.memory_space<vmem>>, %arg5: memref<2x16xf32, #tpu.memory_space<vmem>>, %arg6: memref<2x16xf32, #tpu.memory_space<vmem>>) attributes {dimension_semantics = [#tpu.dimension_semantics<parallel>], iteration_bounds = array<i64: 1>, scalar_prefetch = 0 : i64, scratch_operands = 0 : i64, tpu.core_type = #tpu.core_type<tc>, window_params = [{pipeline_mode = #tpu.pipeline_mode<synchronous>, transform_indices = @transform_0, window_bounds = array<i64: 1, 16>}, {pipeline_mode = #tpu.pipeline_mode<synchronous>, transform_indices = @transform_1, window_bounds = array<i64: 1, 16>}, {pipeline_mode = #tpu.pipeline_mode<synchronous>, transform_indices = @transform_2, window_bounds = array<i64: 1, 16>}, {transform_indices = @transform_3, window_bounds = array<i64: 2, 16>}, {transform_indices = @transform_4, window_bounds = array<i64: 2, 16>}, {transform_indices = @transform_5, window_bounds = array<i64: 2, 16>}]} {
    %c0 = arith.constant 0 : index
    %c0_0 = arith.constant 0 : index
    %0 = vector.load %arg4[%c0, %c0_0] : memref<2x16xf32, #tpu.memory_space<vmem>>, vector<2x16xf32>
    %c0_1 = arith.constant 0 : index
    %c0_2 = arith.constant 0 : index
    %1 = vector.load %arg5[%c0_1, %c0_2] : memref<2x16xf32, #tpu.memory_space<vmem>>, vector<2x16xf32>
    %c0_3 = arith.constant 0 : index
    %c0_4 = arith.constant 0 : index
    %2 = vector.load %arg1[%c0_3, %c0_4] : memref<1x16xf32, #tpu.memory_space<vmem>>, vector<1x16xf32>
    %c0_5 = arith.constant 0 : index
    %c0_6 = arith.constant 0 : index
    %3 = vector.load %arg2[%c0_5, %c0_6] : memref<1x16xf32, #tpu.memory_space<vmem>>, vector<1x16xf32>
    %4 = vector.broadcast %3 : vector<1x16xf32> to vector<2x16xf32>
    %5 = arith.mulf %4, %0 : vector<2x16xf32>
    %6 = vector.broadcast %2 : vector<1x16xf32> to vector<2x16xf32>
    %7 = arith.addf %6, %5 : vector<2x16xf32>
    %c0_7 = arith.constant 0 : index
    %c0_8 = arith.constant 0 : index
    %8 = vector.load %arg3[%c0_7, %c0_8] : memref<1x16xf32, #tpu.memory_space<vmem>>, vector<1x16xf32>
    %9 = vector.broadcast %8 : vector<1x16xf32> to vector<2x16xf32>
    %10 = arith.mulf %9, %1 : vector<2x16xf32>
    %11 = arith.addf %7, %10 : vector<2x16xf32>
    %cst = arith.constant 0.000000e+00 : f32
    %cst_9 = arith.constant 1.000000e+00 : f32
    %12 = vector.broadcast %cst : f32 to vector<2x16xf32>
    %13 = arith.maximumf %12, %11 : vector<2x16xf32>
    %14 = vector.broadcast %cst_9 : f32 to vector<2x16xf32>
    %15 = arith.minimumf %14, %13 : vector<2x16xf32>
    %c0_10 = arith.constant 0 : index
    %c0_11 = arith.constant 0 : index
    %16 = vector.load %arg6[%c0_10, %c0_11] : memref<2x16xf32, #tpu.memory_space<vmem>>, vector<2x16xf32>
    tpu.vector_store %arg6[%c0_10, %c0_11], %15 {strides = array<i32>} : memref<2x16xf32, #tpu.memory_space<vmem>>, vector<2x16xf32>,
    return
  }
  func.func @transform_0(%arg0: i32) -> (i32, i32) {
    %c0_i32 = arith.constant 0 : i32
    %c0_i32_0 = arith.constant 0 : i32
    %c0_i32_1 = arith.constant 0 : i32
    return %c0_i32, %c0_i32_0 : i32, i32
  }
  func.func @transform_1(%arg0: i32) -> (i32, i32) {
    %c0_i32 = arith.constant 0 : i32
    %c0_i32_0 = arith.constant 0 : i32
    %c0_i32_1 = arith.constant 0 : i32
    return %c0_i32, %c0_i32_0 : i32, i32
  }
  func.func @transform_2(%arg0: i32) -> (i32, i32) {
    %c0_i32 = arith.constant 0 : i32
    %c0_i32_0 = arith.constant 0 : i32
    %c0_i32_1 = arith.constant 0 : i32
    return %c0_i32, %c0_i32_0 : i32, i32
  }
  func.func @transform_3(%arg0: i32) -> (i32, i32) {
    %c0_i32 = arith.constant 0 : i32
    %c0_i32_0 = arith.constant 0 : i32
    return %arg0, %c0_i32 : i32, i32
  }
  func.func @transform_4(%arg0: i32) -> (i32, i32) {
    %c0_i32 = arith.constant 0 : i32
    %c0_i32_0 = arith.constant 0 : i32
    return %arg0, %c0_i32 : i32, i32
  }
  func.func @transform_5(%arg0: i32) -> (i32, i32) {
    %c0_i32 = arith.constant 0 : i32
    %c0_i32_0 = arith.constant 0 : i32
    return %arg0, %c0_i32 : i32, i32
  }
}

</mosaic_0001>

<bundles_post_ra>
// kernel: tpu_custom_call.1
= control target key start
LH: loop header
LB: loop body
LE: loop exit
PB: predicated region body
PF: predicated region fallthrough
CT: control target
= control target key end

     0   :  { %10 = vsyncpa [#allocation3], 0  ;;  %s200_s0 = inlined_call_operand.hbm [shape: f32[1,16], index: 0, kind: input, shape index: {}]   ;;  %s201_s1 = inlined_call_operand.vmem [shape: f32[1,16], index: 1, kind: input, shape index: {}]   ;;  %s202_s2 = inlined_call_operand.vmem [shape: f32[1,16], index: 2, kind: input, shape index: {}]   ;;  %s203_s3 = inlined_call_operand.vmem [shape: f32[2,16], index: 3, kind: input, shape index: {}]   ;;  %s204_s4 = inlined_call_operand.vmem [shape: f32[2,16], index: 4, kind: input, shape index: {}]   ;;  %s205_s5 = inlined_call_operand.hbm [shape: f32[2,16], index: 5, kind: output, shape index: {}]  }
   0x1   :  { %11 = vsyncpa [#allocation4], 0  ;;  %s132_s18 = smov [#allocation2]   ;;  %s84_s22 = scalar_lea.hbm %s200_s0, 16 }
   0x2   :  { %s18_s19 = sshll.u32 %s132_s18, 4  ;;  %p85_p0 = scmp.ne.s32.totalorder %s200_s0, %s84_s22  ;;  %s19_s19 = int_to_ptr.vmem [resolvable:$true] %s18_s19 }
   0x3   :  { %p88_p1 = scmp.lt.u32.totalorder %s84_s22, %s200_s0 }
   0x5   :  { %p90_p2 = pnand %p88_p1, %p85_p0 }
   0x7   :  { %93 = shalt.err (!%p90_p2)
}
   0x8   :  { %s94_s27 = scalar_lea.vmem %s19_s19, 16  ;;  %s98_s28 = scalar_lea.vmem %s19_s19, 32 }
   0x9   :  { %p95_p3 = scmp.ne.s32.totalorder %s19_s19, %s94_s27  ;;  %p99_p4 = scmp.lt.s32.totalorder %s19_s19, %s19_s19 }
   0xa   :  { %p100_p5 = scmp.lt.s32.totalorder %s98_s28, %s94_s27 }
   0xc   :  { %p101_p6 = por %p100_p5, %p99_p4 }
   0xe   :  { %p102_p7 = pnand %p101_p6, %p95_p3 }
  0x10   :  { %105 = shalt.err (!%p102_p7)
}
  0x11   :  { %21 = dma.hbm_to_vmem [thread:$0]  %s200_s0, 16, %s19_s19, [#allocation3]  }
  0x12   :  { %128 = dma.done.wait [#allocation3], 16  }
  0x13   :  { %129 = vsyncadd [#allocation3], 4294967280  ;;  %v33_v0 = vld [vmem:[%s203_s3] sm:$0x3]  ;;  %v80_v2 = vld [vmem:[#allocation2] ss:$0 sm:$0xff] }
  0x14   :  { %v34_v1 = vld [vmem:[%s204_s4] sm:$0x3]  ;;  %s133_s0 = smov [#allocation5]   ;;  %vm62_vm0 = vcmask 123904  }
  0x15   :  { %v79_v3 = vld [vmem:[%s201_s1] ss:$0 sm:$0xff]  ;;  %s70_s14 = sshll.u32 %s133_s0, 4  ;;  %s71_s14 = int_to_ptr.vmem [resolvable:$true] %s70_s14 }
  0x16   :  { %v81_v4 = vld [vmem:[%s202_s2] ss:$0 sm:$0xff]  ;;  %v43_v5 = vmul.f32 %v79_v3, %v33_v0  ;;  %s106_s3 = scalar_lea.vmem %s71_s14, 32  ;;  %p111_p9 = scmp.lt.s32.totalorder %s71_s14, %s71_s14 }
  0x17   :  { %v58_v6 = vmul.f32 %v81_v4, %v34_v1  ;;  %p107_p8 = scmp.ne.s32.totalorder %s71_s14, %s106_s3  ;;  %p112_p10 = scmp.lt.s32.totalorder %s106_s3, %s106_s3 }
  0x18   :  { %v50_v7 = vadd.f32 %v80_v2, %v43_v5 }
  0x19   :  { %p113_p11 = por %p112_p10, %p111_p9 }
  0x1a   :  { %v59_v8 = vadd.f32 %v58_v6, %v50_v7 }
  0x1b   :  { %p114_p12 = pnand %p113_p11, %p107_p8 }
  0x1c   :  { %v60_v9 = vmax.f32 %v59_v8, 0.0 }
  0x1e   :  { %v61_v10 = vmin.f32 %v60_v9, 1.0 }
  0x20   :  { %63 = vst.msk [vmem:[#allocation5] sm:$0x3] %vm62_vm0, %v61_v10 }
  0x21   :  { %117 = shalt.err (!%p114_p12)
}
  0x22   :  { %s118_s4 = scalar_lea.hbm %s205_s5, 32 }
  0x23   :  { %p119_p13 = scmp.ne.s32.totalorder %s205_s5, %s118_s4  ;;  %p122_p0 = scmp.lt.u32.totalorder %s118_s4, %s205_s5 }
  0x25   :  { %p124_p1 = pnand %p122_p0, %p119_p13 }
  0x27   :  { %127 = shalt.err (!%p124_p1)
}
  0x28   :  { %73 = dma.vmem_to_hbm [thread:$0]  %s71_s14, 32, %s205_s5, [#allocation4]  }
  0x29   :  { %130 = dma.done.wait [#allocation4], 32  }
  0x2a   :  { %131 = vsyncadd [#allocation4], 4294967264 }
  0x2b   :  { %77 = vsyncpa [#allocation3], 1 }
  0x2c   :  { %78 = vsyncpa [#allocation4], 1 }

</bundles_post_ra>
